<compile_context>
chip_gen: v5e
topology: v5e:2x2
jax: 0.10.0
libtpu: 0.0.40
codegen_flags: <defaults>
</compile_context>

<pallas_src>
import jax
import jax.numpy as jnp
from jax.experimental import pallas as pl
from jax.experimental.pallas import tpu as pltpu


def _upsample_kernel(x_ref, r_ref, o_ref):
    # x_ref: (Rb, K)   folded input rows
    # r_ref: (K, L)    0/1 replication matrix (one 1.0 per column -> exact copies)
    # o_ref: (Rb, L)   folded output rows (lane-dense, L % 256 == 0 when possible)
    comp = r_ref.dtype
    y = jnp.dot(x_ref[...].astype(comp), r_ref[...], preferred_element_type=comp)
    o_ref[...] = y.astype(o_ref.dtype)


def _pick_fold(total_rows: int, W: int) -> int:
    """Smallest divisor F of total_rows making L = 4*F*W a multiple of 256
    (falling back to 128), with L bounded so the resident replication matrix
    stays small.  Never silently degrades to masked (<128-lane) stores when an
    aligned divisor exists."""
    four_w = 4 * W
    max_f = max(1, min(total_rows, 2048 // max(four_w, 1)))   # keep L <= 2048
    divs = [f for f in range(1, max_f + 1) if total_rows % f == 0]
    for align in (256, 128):
        for f in divs:
            if (four_w * f) % align == 0:
                return f
    return divs[-1]   # best effort: widest lane dim among the small divisors


def _pick_block_rows(total: int, cap: int, step: int) -> int:
    """Largest multiple of `step` that divides `total` and is <= cap.  If none
    exists, return `cap` (the grid then uses pl.cdiv with a ragged last block)
    instead of ever returning one giant `total`-row block."""
    if total <= step:
        return total
    cap = max(step, min(total, cap))
    best = 0
    for r in range(step, cap + 1, step):
        if total % r == 0:
            best = r
    return best if best else cap


def upsample_nearest_2x(x: jax.Array) -> jax.Array:
    """Nearest-neighbor upsample by 2 along H and W for an NCHW tensor."""
    N, C, H, W = x.shape
    Ho, Wo = 2 * H, 2 * W
    dtype = x.dtype
    itemsize = jnp.dtype(dtype).itemsize

    total_rows = N * C * H                     # flattened input rows

    # ---- fold selection: lane-dense, 256-aligned output super-rows ----------
    F = _pick_fold(total_rows, W)
    G = total_rows // F                        # number of super-rows
    K = F * W                                  # folded input row width (MXU K)
    L = 4 * F * W                              # folded output row width (lanes)

    # Compute dtype: bf16 stays bf16 (single exact MXU pass, no cast pass);
    # everything else (f32, ints -- v7x MXU has no int path) goes through f32.
    # Note: int32 values beyond 2^24 would lose precision on this path.
    comp_dtype = jnp.bfloat16 if dtype == jnp.bfloat16 else jnp.float32

    # RF[j, m] = 1 iff output element m of a super-row replicates input element
    # j of that super-row: out row 2r and 2r+1 <- in row r; out col 2c, 2c+1 <-
    # in col c.  Exactly one 1.0 per column -> every output is an exact copy.
    j = jnp.arange(K, dtype=jnp.int32)
    m = jnp.arange(L, dtype=jnp.int32)
    fold_row = (m // Wo) // 2                  # input row within the fold
    src_col = (m % Wo) // 2                    # input column
    RF = (j[:, None] == (fold_row * W + src_col)[None, :]).astype(comp_dtype)

    # ---- row blocking: ~2 MiB input / ~8 MiB output per grid step.  Double-
    # buffered working set ~20 MiB (+ RF), safe on v5e/v6e (128 MiB physical)
    # and under v7x's 64 MiB with the explicit limit below; >= ~4 steps when
    # possible so the pipeline and both v7x TensorCores have work.
    sublane = max(8, 32 // itemsize)           # 8 f32 / 16 bf16 / 32 int8
    in_block_budget = 2 << 20                  # bytes of input per grid step
    max_rows = max(sublane, in_block_budget // (K * itemsize))
    cap = min(max_rows, max(sublane, G // 4))
    Rb = _pick_block_rows(G, cap, sublane)
    grid = (pl.cdiv(G, Rb),)

    bytes_accessed = (G * K + G * L + K * L) * itemsize

    out_flat = pl.pallas_call(
        _upsample_kernel,
        out_shape=jax.ShapeDtypeStruct((G, L), dtype),
        grid=grid,
        in_specs=[
            pl.BlockSpec((Rb, K), lambda i: (i, 0)),
            pl.BlockSpec((K, L), lambda i: (0, 0)),    # resident; fetched once
        ],
        out_specs=pl.BlockSpec((Rb, L), lambda i: (i, 0)),
        compiler_params=pltpu.CompilerParams(
            dimension_semantics=("parallel",),
            vmem_limit_bytes=48 * 1024 * 1024,
        ),
        cost_estimate=pl.CostEstimate(
            flops=0, transcendentals=0, bytes_accessed=bytes_accessed),
    )(x.reshape(G, K), RF)

    # (G, 4*F*W) row-major is exactly (N, C, 2H, 2W) row-major: free reshape.
    return out_flat.reshape(N, C, Ho, Wo)


if __name__ == "__main__":
    key = jax.random.PRNGKey(0)
    x = jax.random.normal(key, (2, 4, 16, 16), dtype=jnp.float32)  # NCHW

    y = jax.block_until_ready(upsample_nearest_2x(x))

    # Reference: pure-JAX nearest upsample (matches torch nn.Upsample nearest x2).
    y_ref = jnp.repeat(jnp.repeat(x, 2, axis=2), 2, axis=3)

    assert y.shape == (2, 4, 32, 32)
    assert y.dtype == x.dtype
    assert jnp.allclose(y, y_ref), "mismatch vs reference nearest upsample"
    print("KERNEL_OK")
</pallas_src>

<mosaic_0001>
module attributes {stable_mosaic.version = 11 : i64} {
  func.func @_upsample_kernel(%arg0: i32, %arg1: memref<8x64xf32, #tpu.memory_space<vmem>>, %arg2: memref<64x256xf32, #tpu.memory_space<vmem>>, %arg3: memref<8x256xf32, #tpu.memory_space<vmem>>) attributes {dimension_semantics = [#tpu.dimension_semantics<parallel>], iteration_bounds = array<i64: 4>, scalar_prefetch = 0 : i64, scratch_operands = 0 : i64, tpu.core_type = #tpu.core_type<tc>, window_params = [{transform_indices = @transform_0, window_bounds = array<i64: 8, 64>}, {pipeline_mode = #tpu.pipeline_mode<synchronous>, transform_indices = @transform_1, window_bounds = array<i64: 64, 256>}, {transform_indices = @transform_2, window_bounds = array<i64: 8, 256>}]} {
    %c0 = arith.constant 0 : index
    %c0_0 = arith.constant 0 : index
    %0 = vector.load %arg1[%c0, %c0_0] : memref<8x64xf32, #tpu.memory_space<vmem>>, vector<8x64xf32>
    %c0_1 = arith.constant 0 : index
    %c0_2 = arith.constant 0 : index
    %1 = vector.load %arg2[%c0_1, %c0_2] : memref<64x256xf32, #tpu.memory_space<vmem>>, vector<64x256xf32>
    %cst = arith.constant dense<0.000000e+00> : vector<8x256xf32>
    %2 = tpu.matmul %0, %1, %cst {dimension_numbers = #tpu.dot_dimension_numbers<[1], [0], [0], [1], [0, 0, 1, 1], [], []>} : vector<8x64xf32>, vector<64x256xf32>, vector<8x256xf32> -> vector<8x256xf32>
    %c0_3 = arith.constant 0 : index
    %c0_4 = arith.constant 0 : index
    %3 = vector.load %arg3[%c0_3, %c0_4] : memref<8x256xf32, #tpu.memory_space<vmem>>, vector<8x256xf32>
    tpu.vector_store %arg3[%c0_3, %c0_4], %2 {strides = array<i32>} : memref<8x256xf32, #tpu.memory_space<vmem>>, vector<8x256xf32>,
    return
  }
  func.func @transform_0(%arg0: i32) -> (i32, i32) {
    %c0_i32 = arith.constant 0 : i32
    %c0_i32_0 = arith.constant 0 : i32
    return %arg0, %c0_i32 : i32, i32
  }
  func.func @transform_1(%arg0: i32) -> (i32, i32) {
    %c0_i32 = arith.constant 0 : i32
    %c0_i32_0 = arith.constant 0 : i32
    %c0_i32_1 = arith.constant 0 : i32
    return %c0_i32, %c0_i32_0 : i32, i32
  }
  func.func @transform_2(%arg0: i32) -> (i32, i32) {
    %c0_i32 = arith.constant 0 : i32
    %c0_i32_0 = arith.constant 0 : i32
    return %arg0, %c0_i32 : i32, i32
  }
}

</mosaic_0001>

<bundles_post_ra>
// kernel: tpu_custom_call.1
= control target key start
LH: loop header
LB: loop body
LE: loop exit
PB: predicated region body
PF: predicated region fallthrough
CT: control target
= control target key end

     0   :  { %7 = vsyncpa [#allocation3], 0  ;;  %s703_s0 = inlined_call_operand.hbm [shape: f32[32,64], index: 0, kind: input, shape index: {}]   ;;  %s704_s1 = inlined_call_operand.hbm [shape: f32[64,256], index: 1, kind: input, shape index: {}]   ;;  %s705_s2 = inlined_call_operand.hbm [shape: f32[32,256], index: 2, kind: output, shape index: {}]  }
   0x1   :  { %9 = vsyncpa [#allocation3 + $0x1], 0 }
   0x2   :  { %10 = vsyncpa [#allocation6], 0 }
   0x3   :  { %11 = vsyncpa [#allocation4], 0 }
   0x4   :  { %13 = vsyncpa [#allocation4 + $0x1], 0  ;;  %s565_s9 = smov 0   ;;  %s567_s10 = smov 0  }
   0x5   :  { %s569_s11 = smov 0   ;;  %s571_s12 = smov 0  }
   0x6 LB: > { %s108_s15 = sshll.u32 %s704_s1, 4  ;;  %s589_s16 = sadd.s32 4294967295, %s545_s12   ;;  %s545_s12 = sphi %s571_s12, %s714_s12   ;;  %s541_s11 = sphi %s569_s11, %s713_s11   ;;  %s537_s10 = sphi %s567_s10, %s712_s10   ;;  %s533_s9 = sphi %s565_s9, %s711_s9   ;;  %s109_s15 = int_to_ptr.hbm [resolvable:$true] %s108_s15 }
   0x7   : > { %p339_p0 = scmp.ge.s32.totalorder %s545_s12, 1  ;;  %p40_p1 = scmp.eq.s32.totalorder %s589_s16, 0 }
   0x8   : > { %p97_p2 = scmp.lt.s32.totalorder %s545_s12, 5  ;;  %s547_s18 = smov [#allocation5]  }
   0x9   : > { %s110_s19 = sshll.u32 %s547_s18, 4  ;;  %s548_s20 = smov 256   ;;  %s111_s19 = int_to_ptr.vmem [resolvable:$true] %s110_s19 }
   0xa   : > { %p594_p3 = pnand %p339_p0, %p97_p2  ;;  %s549_s21 = smov 16  }
   0xb   : > { %s338_s22 = sadd.s32 4294967294, %s545_s12   ;;  %s604_s23 = sadd.s32 1, %s545_s12  }
   0xc   : > { %p364_p4 = pneg %p594_p3  ;;  %s26_s24 = sadd.s32 1, %s541_s11 }
   0xd   : > { %s23_s25 = ssub.s32 %s545_s12, %s604_s23  ;;  %p33_p6 = scmp.ne.s32.totalorder %s541_s11, %s537_s10 }
   0xe   : > { %p365_p5 = pnand %p364_p4, %p40_p1  ;;  %p24_p7 = scmp.eq.s32.totalorder %s23_s25, 0 }
   0xf   : > { %p34_p8 = scmp.eq.s32.totalorder %s545_s12, 0  ;;  %p39_p9 = scmp.ne.s32.totalorder %s537_s10, %s533_s9 }
  0x10   : > { %367 = dma.hbm_to_vmem [thread:$0]  (!%p365_p5), %s109_s15, 2048, %s111_s19, [#allocation6], %s548_s20, %s548_s20, %s549_s21  }
  0x11   : > { %p84_p10 = scmp.eq.s32.totalorder %s589_s16, 3  ;;  %p620_p11 = por %p40_p1, %p39_p9 }
  0x12   : > { %s616_s26 = scalar_select %p24_p7, %s541_s11, %s26_s24  }
  0x13   : > { %p624_p12 = por %p84_p10, %p33_p6  ;;  %p90_p13 = scmp.eq.s32.totalorder %s338_s22, 3 }
  0x14   : > { %p35_p0 = por %p34_p8, %p33_p6  ;;  %s124_s29 = sand.u32 1, %s541_s11  }
  0x15   : > { %p629_p2 = por %p90_p13, %p39_p9  ;;  %p377_p4 = scmp.lt.s32.totalorder %s545_s12, 4 }
  0x16   : > { %s342_s3 = sshll.u32 %s124_s29, 3  ;;  %s343_s4 = sshll.u32 %s545_s12, 3 }
  0x17   : > { %s132_s7 = scalar_lea.hbm %s703_s0, %s343_s4  ;;  %s128_s13 = scalar_lea.vmem [#allocation2], %s342_s3 }
  0x18   : > { %s134_s8 = sshll.u32 %s132_s7, 4  ;;  %s136_s14 = sshll.u32 %s128_s13, 4  ;;  %s135_s8 = int_to_ptr.hbm [resolvable:$true] %s134_s8  ;;  %s137_s14 = int_to_ptr.vmem [resolvable:$true] %s136_s14 }
  0x19   : > { %p638_p5 = pnand %p377_p4, %p35_p0  ;;  %s125_s18 = scalar_lea.sflag [#allocation3], %s124_s29 }
  0x1a   : > { %s445_s19 = sshra.s32 %s135_s8, 4  ;;  %s452_s24 = scalar_lea.hbm %s703_s0, 32  ;;  %s446_s19 = int_to_ptr.hbm [resolvable:$true] %s445_s19 }
  0x1b   : > { %s447_s20 = scalar_lea.hbm %s446_s19, 8  ;;  %p449_p7 = pneg %p638_p5 }
  0x1c   : > { %p448_p6 = scmp.ne.s32.totalorder %s446_s19, %s447_s20  ;;  %p453_p10 = scmp.lt.s32.totalorder %s446_s19, %s703_s0 }
  0x1d   : > { %p454_p13 = scmp.lt.s32.totalorder %s452_s24, %s447_s20 }
  0x1e   : > { %p450_p8 = pnand %p449_p7, %p448_p6 }
  0x1f   : > { %p455_p0 = por %p454_p13, %p453_p10 }
  0x20   : > { %p451_p9 = pneg %p450_p8 }
  0x22   : > { %p456_p4 = pnand %p455_p0, %p451_p9 }
  0x24   : > { %459 = shalt.err (!%p456_p4)
}
  0x25   : > { %371 = dma.hbm_to_vmem [thread:$0]  (!%p638_p5), %s135_s8, 128, %s137_s14, %s125_s18  }
  0x26   : > { %145 = sbr.rel (%p594_p3) target bundleno = 192 (0xc0), region = 28  ;;  %s655_s29 = sand.u32 (!%p594_p3), 1, %s537_s10  }
  0x27   : > { %s345_s4 = sshll.u32 (!%p594_p3), %s655_s29, 3  ;;  %s148_s5 = scalar_lea.sflag (!%p594_p3), [#allocation3], %s655_s29 }
  0x28   : > { %s659_s6 = scalar_lea.vmem (!%p594_p3), [#allocation2], %s345_s4 }
  0x2b   : > { %520 = dma.done.wait (%p620_p11), %s148_s5, 128  }
  0x2c   : > { %522 = vsyncadd (%p620_p11), %s148_s5, 4294967168 }
  0x2d   : > { %524 = dma.done.wait (%p40_p1), [#allocation6], 2048  }
  0x2e   : > { %526 = vsyncadd (%p40_p1), [#allocation6], 4294965248  ;;  %v193_v0 = vld [vmem:[#allocation5 + $0x70] sm:$0xff]  ;;  %v194_v1 = vld [vmem:[#allocation5 + $0x78] sm:$0xff]  ;;  %vm195_vm0 = vcmask 523264   ;;  %s347_s17 = sshll.u32 %s655_s29, 4 }
  0x2f   : > { %v191_v2 = vld [vmem:[#allocation5 + $0x60] sm:$0xff]  ;;  %207 = vmatpush.msra.mxu0 %v193_v0  ;;  %227 = vmatpush.msra.mxu1 %v194_v1  ;;  %v192_v3 = vld [vmem:[#allocation5 + $0x68] sm:$0xff]  ;;  %v189_v4 = vld [vmem:[#allocation5 + $0x50] sm:$0xff]  ;;  %s355_s27 = sshll.u32 %s589_s16, 4  ;;  %s177_s14 = scalar_lea.vmem [#allocation7], %s347_s17 }
  0x30   : > { %v190_v5 = vld [vmem:[#allocation5 + $0x58] sm:$0xff]  ;;  %v187_v6 = vld [vmem:[#allocation5 + $0x40] sm:$0xff]  ;;  %v188_v7 = vld [vmem:[#allocation5 + $0x48] sm:$0xff]  ;;  %s253_s13 = scalar_lea.hbm %s705_s2, %s355_s27  ;;  %s255_s15 = sshll.u32 %s177_s14, 4  ;;  %s256_s15 = int_to_ptr.vmem [resolvable:$true] %s255_s15 }
  0x31   : > { %208 = vmatpush.msra.mxu0 %v191_v2  ;;  %228 = vmatpush.msra.mxu1 %v192_v3  ;;  %v185_v8 = vld [vmem:[#allocation5 + $0x30] sm:$0xff]  ;;  %v186_v9 = vld [vmem:[#allocation5 + $0x38] sm:$0xff]  ;;  %v183_v10 = vld [vmem:[#allocation5 + $0x20] sm:$0xff]  ;;  %s257_s18 = sshll.u32 %s253_s13, 4  ;;  %s242_s19 = scalar_lea.sflag [#allocation4], %s655_s29  ;;  %s258_s18 = int_to_ptr.hbm [resolvable:$true] %s257_s18 }
  0x32   : > { %v184_v11 = vld [vmem:[#allocation5 + $0x28] sm:$0xff]  ;;  %v181_v12 = vld [vmem:[#allocation5 + $0x10] sm:$0xff]  ;;  %v182_v13 = vld [vmem:[#allocation5 + $0x18] sm:$0xff]  ;;  %s489_s20 = sshra.s32 %s258_s18, 4  ;;  %s495_s24 = scalar_lea.hbm %s705_s2, 64  ;;  %s490_s20 = int_to_ptr.hbm [resolvable:$true] %s489_s20 }
  0x33   : > { %209 = vmatpush.msra.mxu0 %v189_v4  ;;  %229 = vmatpush.msra.mxu1 %v190_v5  ;;  %v179_v14 = vld [vmem:[#allocation5] sm:$0xff]  ;;  %v180_v15 = vld [vmem:[#allocation5 + $0x8] sm:$0xff]  ;;  %v178_v16 = vld [vmem:[%s659_s6] sm:$0xff]  ;;  %s491_s21 = scalar_lea.hbm %s490_s20, 16  ;;  %p496_p5 = scmp.lt.s32.totalorder %s490_s20, %s705_s2 }
  0x34   : > { %p492_p1 = scmp.ne.s32.totalorder %s490_s20, %s491_s21  ;;  %p497_p6 = scmp.lt.s32.totalorder %s495_s24, %s491_s21 }
  0x35   : > { %210 = vmatpush.msra.mxu0 %v187_v6  ;;  %230 = vmatpush.msra.mxu1 %v188_v7 }
  0x36   : > { %p493_p3 = pnand %p492_p1, %p624_p12  ;;  %p498_p7 = por %p497_p6, %p496_p5 }
  0x37   : > { %211 = vmatpush.msra.mxu0 %v185_v8  ;;  %231 = vmatpush.msra.mxu1 %v186_v9 }
  0x38   : > { %p494_p11 = pneg %p493_p3 }
  0x39   : > { %212 = vmatpush.msra.mxu0 %v183_v10  ;;  %232 = vmatpush.msra.mxu1 %v184_v11 }
  0x3a   : > { %p499_p8 = pnand %p498_p7, %p494_p11 }
  0x3b   : > { %213 = vmatpush.msra.mxu0 %v181_v12  ;;  %233 = vmatpush.msra.mxu1 %v182_v13 }
  0x3d   : > { %214 = vmatpush.msra.mxu0 %v179_v14  ;;  %234 = vmatpush.msra.mxu1 %v180_v15 }
  0x3e   : > { %348 = vmatmul.msk.f32.vlgmr.msra.gmra.mxu0 %vm195_vm0, %v178_v16  ;;  %349 = vmatmul.msk.f32.vlgmr.msra.gmra.mxu1 %vm195_vm0, %v178_v16 }
  0xbb   : > { %v216_v17 = vpop.f32.mrf.mxu0  ;;  %v236_v18 = vpop.f32.mrf.mxu1 }
  0xbc   : > { %239 = vst [vmem:[%s177_s14] sm:$0xff] %v216_v17 }
  0xbd   : > { %240 = vst [vmem:[%s177_s14 + $0x8] sm:$0xff] %v236_v18 }
  0xbe   : > { %502 = shalt.err (!%p499_p8)
}
  0xbf   : > { %362 = dma.vmem_to_hbm [thread:$0]  (%p624_p12), %s256_s15, 256, %s258_s18, %s242_s19  }
  0xc0 PF: > { %p379_p9 = scmp.ge.s32.totalorder %s545_s12, 2  ;;  %s269_s29 = sand.u32 1, %s533_s9  }
  0xc1   : > { %s270_s4 = scalar_lea.sflag [#allocation4], %s269_s29 }
  0xc2   : > { %p373_p10 = pnand %p379_p9, %p629_p2 }
  0xc4   : > { %p374_p13 = pneg %p373_p10 }
  0xc6   : > { %528 = dma.done.wait (%p374_p13), %s270_s4, 256  }
  0xc7   : > { %530 = vsyncadd (%p374_p13), %s270_s4, 4294967040  ;;  %p16_p0 = scmp.ge.s32.totalorder %s604_s23, 6   ;;  %s711_s9 = smov %s537_s10 }
  0xc8   : > { %s712_s10 = smov %s541_s11  ;;  %s713_s11 = smov %s616_s26 }
  0xc9   : > { %s714_s12 = smov %s604_s23  ;;  %18 = sbr.rel (!%p16_p0) target bundleno = 6 (0x6), region = 77 }
  0xce   :  { %276 = vsyncpa [#allocation3], 1 }
  0xcf   :  { %278 = vsyncpa [#allocation3 + $0x1], 1 }
  0xd0   :  { %279 = vsyncpa [#allocation6], 1 }
  0xd1   :  { %280 = vsyncpa [#allocation4], 1 }
  0xd2   :  { %282 = vsyncpa [#allocation4 + $0x1], 1 }

</bundles_post_ra>
